<compile_context>
chip_gen: v6e
topology: v6e:2x2x1
jax: 0.10.0
libtpu: 0.0.40
codegen_flags: <defaults>
</compile_context>

<pallas_src>
import jax
import jax.numpy as jnp
from jax.experimental import pallas as pl
from jax.experimental.pallas import tpu as pltpu


def _round_up(x, m):
    return ((x + m - 1) // m) * m


# VMEM sizing: keep the double-buffered working set inside the scoped budget
# of every target generation (v5e/v6e default 16/32 MiB scoped; v7x has only
# 64 MiB *physical*).  We size tiles against _VMEM_BUDGET and raise the scoped
# limit explicitly to _VMEM_LIMIT (safely below v7x's 64 MiB physical).
_VMEM_BUDGET = 24 * 1024 * 1024
_VMEM_LIMIT = 40 * 1024 * 1024


# ------------------------------- kernels -----------------------------------

def _head_kernel_single_k(x_ref, w_ref, o_ref):
    # n_embd fits one K tile: no reduction axis, no accumulator, 2-D parallel grid.
    o_ref[...] = jnp.dot(x_ref[...], w_ref[...],
                         preferred_element_type=jnp.float32).astype(o_ref.dtype)


def _head_kernel_multi_k_f32out(x_ref, w_ref, o_ref):
    # f32 output: accumulate straight into the resident output tile (no scratch).
    @pl.when(pl.program_id(2) == 0)
    def _init():
        o_ref[...] = jnp.zeros_like(o_ref)

    o_ref[...] += jnp.dot(x_ref[...], w_ref[...],
                          preferred_element_type=jnp.float32)


def _head_kernel_multi_k_acc(x_ref, w_ref, o_ref, acc_ref):
    # narrow output dtype: accumulate in an f32 scratch, cast once at the end.
    @pl.when(pl.program_id(2) == 0)
    def _init():
        acc_ref[...] = jnp.zeros_like(acc_ref)

    acc_ref[...] += jnp.dot(x_ref[...], w_ref[...],
                            preferred_element_type=jnp.float32)

    @pl.when(pl.program_id(2) == pl.num_programs(2) - 1)
    def _finalize():
        o_ref[...] = acc_ref[...].astype(o_ref.dtype)


# ------------------------------- module ------------------------------------

class GPT4EHRHeadPallas:
    """Pallas TPU equivalent of GPT4EHRHead.

    forward(hidden_state) = hidden_state @ model_embeddings_weights
    (tied decoder, no bias).  Construct once; the embedding matrix is padded
    and laid out once here, never per forward call.
    """

    def __init__(self, model_embeddings_weights, *, compute_dtype=None):
        w = jnp.asarray(model_embeddings_weights)
        assert w.ndim == 2, w.shape
        self.n_embd, self.vocab = int(w.shape[0]), int(w.shape[1])

        # Opt-in bf16 (v6e/v5e) path: pass compute_dtype=jnp.bfloat16.
        # Default keeps the weight's dtype (f32 -> exact match to PyTorch).
        # TODO(synk): fp8 (v7x) / int8+scale (v5e/v6e) weight quantization path.
        self.compute_dtype = jnp.dtype(compute_dtype) if compute_dtype is not None \
            else jnp.dtype(w.dtype)
        in_size = self.compute_dtype.itemsize
        self._sub = max(8, 32 // in_size)           # sublane packing of compute dtype

        K, N = self.n_embd, self.vocab
        kp128 = _round_up(K, 128)
        np128 = _round_up(N, 128)

        # K tile: collapse the reduction axis whenever n_embd fits one tile
        # (typical GPT n_embd 768..2048).
        tk = kp128 if kp128 <= 2048 else 1024
        # M tile ceiling; per-call tm <= this, and small-M calls collapse to one tile.
        tm_max = 1024 if in_size <= 2 else 512
        # N tile: large and lane-dense, but keep >= 2 N tiles so both v7x
        # TensorCores get work even when the M axis collapses to a single tile.
        tn = min(1024, np128)
        if np128 >= 256:
            tn = min(tn, _round_up(max(np128 // 2, 128), 128))

        def footprint(tm_, tn_, tk_):
            in_bytes = 2 * (tm_ * tk_ + tk_ * tn_) * in_size     # double-buffered inputs
            out_bytes = 2 * tm_ * tn_ * 4                        # output tile (f32 worst case)
            acc_bytes = tm_ * tn_ * 4                            # possible accumulator
            return in_bytes + out_bytes + acc_bytes

        # Shrink (lane/sublane aligned) until the worst-case footprint fits.
        while footprint(tm_max, tn, tk) > _VMEM_BUDGET:
            if tn > 256:
                tn = max(128, _round_up(tn // 2, 128))
            elif tm_max > 256:
                tm_max //= 2
            elif tk > 512:
                tk = max(128, _round_up(tk // 2, 128))
            else:
                break

        self._tm_max, self._tn, self._tk = tm_max, tn, tk
        self._Kp, self._Np = _round_up(K, tk), _round_up(N, tn)

        # Pre-pad the (large) embedding matrix ONCE; forward never re-copies it.
        if (self._Kp, self._Np) != (K, N):
            w = jnp.pad(w, ((0, self._Kp - K), (0, self._Np - N)))
        self._w = w.astype(self.compute_dtype)

    def __call__(self, hidden_state, *, force_pallas=False):
        h = jnp.asarray(hidden_state)
        K, N = self.n_embd, self.vocab
        assert h.shape[-1] == K, (h.shape, K)
        lead = h.shape[:-1]
        out_dtype = h.dtype

        x = h.reshape(-1, K).astype(self.compute_dtype)
        M = x.shape[0]
        Kp, Np = self._Kp, self._Np

        # Tiny problems: a single (padded) grid step with mostly redundant
        # FLOPs is slower than XLA's fused dot -- fall back.
        if not force_pallas and M <= 256 and Kp <= 512 and Np <= 512:
            if Kp != K:
                x = jnp.pad(x, ((0, 0), (0, Kp - K)))
            out = jnp.dot(x, self._w,
                          preferred_element_type=jnp.float32)[:, :N]
            return out.astype(out_dtype).reshape(lead + (N,))

        # Collapse the M grid axis for small M (decode / small batch): the
        # embedding matrix is then streamed from HBM exactly once.
        mp_min = _round_up(M, self._sub)
        tm = mp_min if mp_min <= self._tm_max else self._tm_max
        Mp = _round_up(M, tm)
        tn, tk = self._tn, self._tk

        if (Mp, Kp) != (M, K):
            x = jnp.pad(x, ((0, Mp - M), (0, Kp - K)))   # tail-only padding of the small operand

        gm, gn, gk = Mp // tm, Np // tn, Kp // tk

        in_size = self.compute_dtype.itemsize
        out_size = jnp.dtype(out_dtype).itemsize
        cost = pl.CostEstimate(
            flops=2 * M * N * K,
            transcendentals=0,
            # Actual streamed bytes: x is re-read per N tile, w per M tile.
            bytes_accessed=int(M * K * gn * in_size
                               + K * N * gm * in_size
                               + M * N * out_size),
        )

        if gk == 1:
            kernel = _head_kernel_single_k
            grid = (gm, gn)
            in_specs = [pl.BlockSpec((tm, tk), lambda i, j: (i, 0)),
                        pl.BlockSpec((tk, tn), lambda i, j: (0, j))]
            out_specs = pl.BlockSpec((tm, tn), lambda i, j: (i, j))
            scratch = []
            sems = ("parallel", "parallel")
        else:
            grid = (gm, gn, gk)
            in_specs = [pl.BlockSpec((tm, tk), lambda i, j, k: (i, k)),
                        pl.BlockSpec((tk, tn), lambda i, j, k: (k, j))]
            out_specs = pl.BlockSpec((tm, tn), lambda i, j, k: (i, j))
            sems = ("parallel", "parallel", "arbitrary")
            if jnp.dtype(out_dtype) == jnp.dtype(jnp.float32):
                kernel = _head_kernel_multi_k_f32out
                scratch = []
            else:
                kernel = _head_kernel_multi_k_acc
                scratch = [pltpu.VMEM((tm, tn), jnp.float32)]

        out = pl.pallas_call(
            kernel,
            out_shape=jax.ShapeDtypeStruct((Mp, Np), out_dtype),
            grid_spec=pltpu.PrefetchScalarGridSpec(
                num_scalar_prefetch=0,
                grid=grid,
                in_specs=in_specs,
                out_specs=out_specs,
                scratch_shapes=scratch,
            ),
            compiler_params=pltpu.CompilerParams(
                dimension_semantics=sems,
                vmem_limit_bytes=_VMEM_LIMIT,
            ),
            cost_estimate=cost,
        )(x, self._w)

        if (Mp, Np) != (M, N):
            out = out[:M, :N]
        return out.reshape(lead + (N,))


def gpt4ehr_head(hidden_state, model_embeddings_weights, **kwargs):
    """One-shot functional wrapper (prefer the class to reuse the prepared weights)."""
    return GPT4EHRHeadPallas(model_embeddings_weights)(hidden_state, **kwargs)


if __name__ == "__main__":
    # Small shapes consistent with the module: batch=2, seq=8, n_embd=32,
    # vocab (# of medical codes) = 64.  model_embeddings_weights: (n_embd, vocab),
    # so decoder = Linear(32, 64, bias=False) with tied (transposed) weights.
    batch, seq, n_embd, vocab = 2, 8, 32, 64
    key = jax.random.PRNGKey(0)
    kx, kw = jax.random.split(key)

    # Integer-valued f32 inputs keep the MXU matmul exactly representable,
    # giving a tight check regardless of the hardware precision path.
    hidden_state = jax.random.randint(kx, (batch, seq, n_embd), -3, 4).astype(jnp.float32)
    model_embeddings_weights = jax.random.randint(kw, (n_embd, vocab), -3, 4).astype(jnp.float32)

    head = GPT4EHRHeadPallas(model_embeddings_weights)

    # Exercise the Pallas kernel path explicitly (tiny shapes would otherwise
    # take the XLA fallback), plus the default dispatch path.
    logits_pallas = jax.block_until_ready(head(hidden_state, force_pallas=True))
    logits_default = jax.block_until_ready(head(hidden_state))

    # Reference: nn.Linear with weight = E.T and no bias  ->  h @ E
    ref = jnp.einsum("bsk,kn->bsn", hidden_state, model_embeddings_weights,
                     precision=jax.lax.Precision.HIGHEST)

    assert logits_pallas.shape == (batch, seq, vocab), logits_pallas.shape
    assert logits_pallas.dtype == hidden_state.dtype
    assert jnp.allclose(logits_pallas, ref, atol=1e-5, rtol=1e-5)
    assert jnp.allclose(logits_default, ref, atol=1e-5, rtol=1e-5)

    print("KERNEL_OK")
</pallas_src>

<mosaic_0001>
module attributes {stable_mosaic.version = 11 : i64} {
  func.func @_head_kernel_single_k(%arg0: i32, %arg1: i32, %arg2: memref<16x128xf32, #tpu.memory_space<vmem>>, %arg3: memref<128x128xf32, #tpu.memory_space<vmem>>, %arg4: memref<16x128xf32, #tpu.memory_space<vmem>>) attributes {dimension_semantics = [#tpu.dimension_semantics<parallel>, #tpu.dimension_semantics<parallel>], iteration_bounds = array<i64: 1, 1>, scalar_prefetch = 0 : i64, scratch_operands = 0 : i64, tpu.core_type = #tpu.core_type<tc>, window_params = [{transform_indices = @transform_0, window_bounds = array<i64: 16, 128>}, {transform_indices = @transform_1, window_bounds = array<i64: 128, 128>}, {transform_indices = @transform_2, window_bounds = array<i64: 16, 128>}]} {
    %c0 = arith.constant 0 : index
    %c0_0 = arith.constant 0 : index
    %0 = vector.load %arg2[%c0, %c0_0] : memref<16x128xf32, #tpu.memory_space<vmem>>, vector<16x128xf32>
    %c0_1 = arith.constant 0 : index
    %c0_2 = arith.constant 0 : index
    %1 = vector.load %arg3[%c0_1, %c0_2] : memref<128x128xf32, #tpu.memory_space<vmem>>, vector<128x128xf32>
    %cst = arith.constant dense<0.000000e+00> : vector<16x128xf32>
    %2 = tpu.matmul %0, %1, %cst {dimension_numbers = #tpu.dot_dimension_numbers<[1], [0], [0], [1], [0, 0, 1, 1], [], []>} : vector<16x128xf32>, vector<128x128xf32>, vector<16x128xf32> -> vector<16x128xf32>
    %c0_3 = arith.constant 0 : index
    %c0_4 = arith.constant 0 : index
    %3 = vector.load %arg4[%c0_3, %c0_4] : memref<16x128xf32, #tpu.memory_space<vmem>>, vector<16x128xf32>
    tpu.vector_store %arg4[%c0_3, %c0_4], %2 {strides = array<i32>} : memref<16x128xf32, #tpu.memory_space<vmem>>, vector<16x128xf32>,
    return
  }
  func.func @transform_0(%arg0: i32, %arg1: i32) -> (i32, i32) {
    %c0_i32 = arith.constant 0 : i32
    %c0_i32_0 = arith.constant 0 : i32
    return %arg0, %c0_i32 : i32, i32
  }
  func.func @transform_1(%arg0: i32, %arg1: i32) -> (i32, i32) {
    %c0_i32 = arith.constant 0 : i32
    %c0_i32_0 = arith.constant 0 : i32
    return %c0_i32, %arg1 : i32, i32
  }
  func.func @transform_2(%arg0: i32, %arg1: i32) -> (i32, i32) {
    %c0_i32 = arith.constant 0 : i32
    return %arg0, %arg1 : i32, i32
  }
}

</mosaic_0001>

<bundles_post_ra>
// kernel: tpu_custom_call.1
= control target key start
LH: loop header
LB: loop body
LE: loop exit
PB: predicated region body
PF: predicated region fallthrough
CT: control target
= control target key end

     0   :  { %7 = vsyncpa [#allocation3], 0  ;;  %s315_s0 = inlined_call_operand.hbm [shape: f32[16,128], index: 0, kind: input, shape index: {}]   ;;  %s316_s1 = inlined_call_operand.hbm [shape: f32[128,128], index: 1, kind: input, shape index: {}]   ;;  %s317_s2 = inlined_call_operand.hbm [shape: f32[16,128], index: 2, kind: output, shape index: {}]  }
   0x1   :  { %8 = vsyncpa [#allocation6], 0 }
   0x2   :  { %9 = vsyncpa [#allocation4], 0  ;;  %s277_s9 = smov [#allocation2]  }
   0x3   :  { %s15_s10 = sshll.u32 %s277_s9, 4  ;;  %s16_s10 = int_to_ptr.vmem [resolvable:$true] %s15_s10 }
   0x4   :  { %s219_s11 = scalar_lea.vmem %s16_s10, 256  ;;  %p224_p1 = scmp.lt.s32.totalorder %s16_s10, %s16_s10 }
   0x5   :  { %p220_p0 = scmp.ne.s32.totalorder %s16_s10, %s219_s11  ;;  %p225_p2 = scmp.lt.s32.totalorder %s219_s11, %s219_s11 }
   0x7   :  { %p226_p3 = por %p225_p2, %p224_p1 }
   0x9   :  { %p227_p4 = pnand %p226_p3, %p220_p0 }
   0xb   :  { %230 = shalt.err (!%p227_p4)
}
   0xc   :  { %s278_s12 = smov 128   ;;  %s279_s13 = smov 8  }
   0xd   :  { %21 = dma.hbm_to_vmem [thread:$0]  %s315_s0, 256, %s16_s10, [#allocation3], %s278_s12, %s278_s12, %s279_s13  }
   0xe   :  { %s280_s16 = smov [#allocation5]  }
   0xf   :  { %s27_s17 = sshll.u32 %s280_s16, 4  ;;  %s28_s17 = int_to_ptr.vmem [resolvable:$true] %s27_s17 }
  0x10   :  { %s239_s18 = scalar_lea.vmem %s28_s17, 2048  ;;  %p244_p6 = scmp.lt.s32.totalorder %s28_s17, %s28_s17 }
  0x11   :  { %p240_p5 = scmp.ne.s32.totalorder %s28_s17, %s239_s18  ;;  %p245_p7 = scmp.lt.s32.totalorder %s239_s18, %s239_s18 }
  0x13   :  { %p246_p8 = por %p245_p7, %p244_p6 }
  0x15   :  { %p247_p9 = pnand %p246_p8, %p240_p5 }
  0x17   :  { %250 = shalt.err (!%p247_p9)
}
  0x18   :  { %33 = dma.hbm_to_vmem [thread:$0]  %s316_s1, 2048, %s28_s17, [#allocation6], %s278_s12, %s278_s12, %s279_s13  }
  0x19   :  { %271 = dma.done.wait [#allocation3], 256  }
  0x1a   :  { %272 = vsyncadd [#allocation3], 4294967040 }
  0x1b   :  { %273 = dma.done.wait [#allocation6], 2048  }
  0x1c   :  { %274 = vsyncadd [#allocation6], 4294965248  ;;  %v57_v0 = vld [vmem:[#allocation5 + $0x78] sm:$0xff]  ;;  %v56_v1 = vld [vmem:[#allocation5 + $0x70] sm:$0xff]  ;;  %s281_s0 = smov [#allocation7]  }
  0x1d   :  { %171 = vmatprep.subr.mxu0 %v57_v0  ;;  %v55_v2 = vld [vmem:[#allocation5 + $0x68] sm:$0xff]  ;;  %v54_v3 = vld [vmem:[#allocation5 + $0x60] sm:$0xff]  ;;  %v40_v4 = vld [vmem:[#allocation2] sm:$0xff]  ;;  %s140_s1 = sshll.u32 %s281_s0, 4  ;;  %s141_s1 = int_to_ptr.vmem [resolvable:$true] %s140_s1 }
  0x1e   :  { %172 = vmatpush3.msra.mxu0 %v57_v0  ;;  %v53_v5 = vld [vmem:[#allocation5 + $0x58] sm:$0xff]  ;;  %203 = vmatprep.mubr.f32.mxu0 %v40_v4  ;;  %v52_v6 = vld [vmem:[#allocation5 + $0x50] sm:$0xff]  ;;  %v51_v7 = vld [vmem:[#allocation5 + $0x48] sm:$0xff]  ;;  %s251_s21 = scalar_lea.vmem %s141_s1, 256  ;;  %p256_p11 = scmp.lt.s32.totalorder %s141_s1, %s141_s1 }
  0x1f   :  { %173 = vmatprep.subr.mxu0 %v56_v1  ;;  %v50_v8 = vld [vmem:[#allocation5 + $0x40] sm:$0xff]  ;;  %v49_v9 = vld [vmem:[#allocation5 + $0x38] sm:$0xff]  ;;  %v48_v10 = vld [vmem:[#allocation5 + $0x30] sm:$0xff]  ;;  %p252_p10 = scmp.ne.s32.totalorder %s141_s1, %s251_s21  ;;  %p257_p12 = scmp.lt.s32.totalorder %s251_s21, %s251_s21 }
  0x20   :  { %174 = vmatpush3.msra.mxu0 %v56_v1  ;;  %v47_v11 = vld [vmem:[#allocation5 + $0x28] sm:$0xff]  ;;  %v46_v12 = vld [vmem:[#allocation5 + $0x20] sm:$0xff]  ;;  %v45_v13 = vld [vmem:[#allocation5 + $0x18] sm:$0xff] }
  0x21   :  { %175 = vmatprep.subr.mxu0 %v55_v2  ;;  %v44_v14 = vld [vmem:[#allocation5 + $0x10] sm:$0xff]  ;;  %v43_v15 = vld [vmem:[#allocation5 + $0x8] sm:$0xff]  ;;  %v42_v16 = vld [vmem:[#allocation5] sm:$0xff]  ;;  %p258_p13 = por %p257_p12, %p256_p11 }
  0x22   :  { %176 = vmatpush3.msra.mxu0 %v55_v2  ;;  %v41_v17 = vld [vmem:[#allocation2 + $0x8] sm:$0xff] }
  0x23   :  { %177 = vmatprep.subr.mxu0 %v54_v3  ;;  %p259_p0 = pnand %p258_p13, %p252_p10 }
  0x24   :  { %178 = vmatpush3.msra.mxu0 %v54_v3 }
  0x25   :  { %179 = vmatprep.subr.mxu0 %v53_v5 }
  0x26   :  { %180 = vmatpush3.msra.mxu0 %v53_v5 }
  0x27   :  { %181 = vmatprep.subr.mxu0 %v52_v6 }
  0x28   :  { %182 = vmatpush3.msra.mxu0 %v52_v6 }
  0x29   :  { %183 = vmatprep.subr.mxu0 %v51_v7 }
  0x2a   :  { %184 = vmatpush3.msra.mxu0 %v51_v7 }
  0x2b   :  { %185 = vmatprep.subr.mxu0 %v50_v8 }
  0x2c   :  { %186 = vmatpush3.msra.mxu0 %v50_v8 }
  0x2d   :  { %187 = vmatprep.subr.mxu0 %v49_v9 }
  0x2e   :  { %188 = vmatpush3.msra.mxu0 %v49_v9 }
  0x2f   :  { %189 = vmatprep.subr.mxu0 %v48_v10 }
  0x30   :  { %190 = vmatpush3.msra.mxu0 %v48_v10 }
  0x31   :  { %191 = vmatprep.subr.mxu0 %v47_v11 }
  0x32   :  { %192 = vmatpush3.msra.mxu0 %v47_v11 }
  0x33   :  { %193 = vmatprep.subr.mxu0 %v46_v12 }
  0x34   :  { %194 = vmatpush3.msra.mxu0 %v46_v12 }
  0x35   :  { %195 = vmatprep.subr.mxu0 %v45_v13 }
  0x36   :  { %196 = vmatpush3.msra.mxu0 %v45_v13 }
  0x37   :  { %197 = vmatprep.subr.mxu0 %v44_v14 }
  0x38   :  { %198 = vmatpush3.msra.mxu0 %v44_v14 }
  0x39   :  { %199 = vmatprep.subr.mxu0 %v43_v15 }
  0x3a   :  { %200 = vmatpush3.msra.mxu0 %v43_v15 }
  0x3b   :  { %201 = vmatprep.subr.mxu0 %v42_v16 }
  0x3c   :  { %202 = vmatpush3.msra.mxu0 %v42_v16 }
  0x3d   :  { %204 = vmatmul.mubr.f32.vlgmr.msra.gmra.mxu0 %v41_v17 }
  0xfd   :  { %v205_v18 = vpop.f32.mrf.mxu0 }
  0xfe   :  { %134 = vst [vmem:[#allocation7 + $0x8] sm:$0xff] %v205_v18 }
  0xff   :  { %v124_v19 = vpop.f32.mrf.mxu0 }
 0x100   :  { %133 = vst [vmem:[#allocation7] sm:$0xff] %v124_v19 }
 0x101   :  { %262 = shalt.err (!%p259_p0)
}
 0x102   :  { %146 = dma.vmem_to_hbm [thread:$0]  %s141_s1, 256, %s317_s2, [#allocation4], %s278_s12, %s278_s12, %s279_s13  }
 0x103   :  { %275 = dma.done.wait [#allocation4], 256  }
 0x104   :  { %276 = vsyncadd [#allocation4], 4294967040 }
 0x105   :  { %150 = vsyncpa [#allocation3], 1 }
 0x106   :  { %151 = vsyncpa [#allocation6], 1 }
 0x107   :  { %152 = vsyncpa [#allocation4], 1 }

</bundles_post_ra>
